<compile_context>
chip_gen: v5e
topology: v5e:2x2
jax: 0.10.0
libtpu: 0.0.40
codegen_flags: <defaults>
</compile_context>

<pallas_src>
import functools

import jax
import jax.numpy as jnp
from jax.experimental import pallas as pl
from jax.experimental.pallas import tpu as pltpu

# Fits v7x's 64 MiB physical VMEM with headroom; well above v5e/v6e scoped defaults.
_VMEM_LIMIT = 48 * 1024 * 1024


def _round_up(x, m):
    return (x + m - 1) // m * m


def _divisor_tile(size, cap, granule, prefer=None):
    """Largest divisor of `size` that is a multiple of `granule` and <= cap.
    If `prefer` is given, a divisor that is also a multiple of `prefer` wins over a
    merely-larger one (256-granule K/N tiles match the 256x256 MXUs of v6e/v7x).
    Only exact divisors are returned -> no silent re-padding downstream."""
    assert size % granule == 0, (size, granule)
    cap = max(granule, min(cap, size))
    best, best_pref = granule, None
    t = granule
    while t <= cap:
        if size % t == 0:
            best = t
            if prefer is not None and t % prefer == 0:
                best_pref = t
        t += granule
    return best_pref if best_pref is not None else best


def _matmul_tiles(mp, n, k):
    tm = _divisor_tile(mp, 512, 16)
    tn = _divisor_tile(n, 512, 128, prefer=256)
    # v7x megacore: keep >= 2 blocks on a "parallel" axis whenever the problem allows.
    if mp // tm == 1 and n // tn == 1:
        if n >= 256:
            tn = _divisor_tile(n, n // 2, 128, prefer=256)
        elif mp >= 32:
            tm = _divisor_tile(mp, mp // 2, 16)
    tk = _divisor_tile(k, 512, 128, prefer=256)
    return tm, tn, tk


def _row_tile(mp, cap=256):
    tm = _divisor_tile(mp, cap, 16)
    if mp // tm == 1 and mp >= 32:
        tm = _divisor_tile(mp, mp // 2, 16)
    return tm


# ------------------------------------------------------------------
# Fused conv-as-matmul Pallas kernels
# ------------------------------------------------------------------

def _mm_kernel(a_ref, b_ref, bias_ref, o_ref, acc_ref, *, relu):
    @pl.when(pl.program_id(2) == 0)
    def _():
        acc_ref[...] = jnp.zeros_like(acc_ref)

    acc_ref[...] += jnp.dot(a_ref[...], b_ref[...],
                            preferred_element_type=jnp.float32)

    @pl.when(pl.program_id(2) == pl.num_programs(2) - 1)
    def _():
        out = acc_ref[...] + bias_ref[...]
        if relu:
            out = jnp.maximum(out, 0.0)
        o_ref[...] = out.astype(o_ref.dtype)


def _mm_res_kernel(a_ref, b_ref, bias_ref, r_ref, o_ref, acc_ref, *, relu):
    @pl.when(pl.program_id(2) == 0)
    def _():
        acc_ref[...] = jnp.zeros_like(acc_ref)

    acc_ref[...] += jnp.dot(a_ref[...], b_ref[...],
                            preferred_element_type=jnp.float32)

    @pl.when(pl.program_id(2) == pl.num_programs(2) - 1)
    def _():
        out = acc_ref[...] + bias_ref[...] + r_ref[...].astype(jnp.float32)
        if relu:
            out = jnp.maximum(out, 0.0)
        o_ref[...] = out.astype(o_ref.dtype)


def fused_matmul(a, b, bias, residual=None, relu=False):
    """relu?((a @ b) + bias (+ residual)).  a:(M,K) bf16, b:(K,N) bf16 (pre-padded),
    bias:(1,N) f32, residual:(M,N) bf16.  MXU runs in bf16, accumulation + epilogue
    stay f32, the stored result is bf16 (carried activation dtype).
    K and N must already be multiples of 128 (weights are pre-padded at init)."""
    a = a.astype(jnp.bfloat16)
    M, K = a.shape
    K2, N = b.shape
    assert K == K2 and K % 128 == 0 and N % 128 == 0, (a.shape, b.shape)
    assert bias.shape == (1, N), bias.shape

    Mp = _round_up(M, 16)            # bf16 packs 16 rows per sublane-packed vreg
    if Mp != M:
        a = jnp.pad(a, ((0, Mp - M), (0, 0)))
        if residual is not None:
            residual = jnp.pad(residual, ((0, Mp - M), (0, 0)))

    TM, TN, TK = _matmul_tiles(Mp, N, K)
    grid = (Mp // TM, N // TN, K // TK)

    a_spec = pl.BlockSpec((TM, TK), lambda i, j, k: (i, k))
    b_spec = pl.BlockSpec((TK, TN), lambda i, j, k: (k, j))
    s_spec = pl.BlockSpec((1, TN), lambda i, j, k: (0, j))
    o_spec = pl.BlockSpec((TM, TN), lambda i, j, k: (i, j))

    if residual is None:
        kernel = functools.partial(_mm_kernel, relu=relu)
        in_specs = [a_spec, b_spec, s_spec]
        operands = (a, b, bias)
    else:
        kernel = functools.partial(_mm_res_kernel, relu=relu)
        in_specs = [a_spec, b_spec, s_spec, o_spec]
        operands = (a, b, bias, residual.astype(jnp.bfloat16))

    out = pl.pallas_call(
        kernel,
        out_shape=jax.ShapeDtypeStruct((Mp, N), jnp.bfloat16),
        grid_spec=pltpu.PrefetchScalarGridSpec(
            num_scalar_prefetch=0,
            grid=grid,
            in_specs=in_specs,
            out_specs=o_spec,
            scratch_shapes=[pltpu.VMEM((TM, TN), jnp.float32)]),
        compiler_params=pltpu.CompilerParams(
            dimension_semantics=("parallel", "parallel", "arbitrary"),
            vmem_limit_bytes=_VMEM_LIMIT),
    )(*operands)
    return out if Mp == M else out[:M]


# ------------------------------------------------------------------
# Max pool (3x3 / stride 2 / pad 1): separable, no 9x tap stack
# ------------------------------------------------------------------

def _max3_kernel(a_ref, b_ref, c_ref, o_ref):
    o_ref[...] = jnp.maximum(jnp.maximum(a_ref[...], b_ref[...]), c_ref[...])


def maxpool_3x3_s2_p1(x):
    """3x3 / stride-2 / pad-1 max pool on NHWC bf16 (channel-padded) activations.
    W-direction 3-tap max via strided slices (XLA glue, no stack materialization),
    H-direction 3-tap max as a Pallas kernel tiled over flattened rows."""
    N, H, W, C = x.shape
    OH = (H + 2 - 3) // 2 + 1
    OW = (W + 2 - 3) // 2 + 1
    xp = jnp.pad(x, ((0, 0), (1, 1), (1, 1), (0, 0)), constant_values=-jnp.inf)

    def w_tap(d):
        return xp[:, :, d:d + 2 * (OW - 1) + 1:2, :]
    wmax = jnp.maximum(jnp.maximum(w_tap(0), w_tap(1)), w_tap(2))   # (N, H+2, OW, C)

    M = N * OH * OW
    Mp = _round_up(M, 16)

    def h_tap(d):
        t = wmax[:, d:d + 2 * (OH - 1) + 1:2].reshape(M, C)
        return t if Mp == M else jnp.pad(t, ((0, Mp - M), (0, 0)))

    TM = _row_tile(Mp)
    out = pl.pallas_call(
        _max3_kernel,
        out_shape=jax.ShapeDtypeStruct((Mp, C), x.dtype),
        grid_spec=pltpu.PrefetchScalarGridSpec(
            num_scalar_prefetch=0,
            grid=(Mp // TM,),
            in_specs=[pl.BlockSpec((TM, C), lambda i: (i, 0)) for _ in range(3)],
            out_specs=pl.BlockSpec((TM, C), lambda i: (i, 0))),
        compiler_params=pltpu.CompilerParams(dimension_semantics=("parallel",),
                                             vmem_limit_bytes=_VMEM_LIMIT),
    )(h_tap(0), h_tap(1), h_tap(2))
    return (out if Mp == M else out[:M]).reshape(N, OH, OW, C)


# ------------------------------------------------------------------
# Bilinear resize (F.interpolate, align_corners=False) as a 4-corner VPU lerp
# ------------------------------------------------------------------

def _lerp4_kernel(x00_ref, x01_ref, x10_ref, x11_ref, w_ref, o_ref):
    w = w_ref[...]
    out = (w[:, 0:1] * x00_ref[...].astype(jnp.float32)
           + w[:, 1:2] * x01_ref[...].astype(jnp.float32)
           + w[:, 2:3] * x10_ref[...].astype(jnp.float32)
           + w[:, 3:4] * x11_ref[...].astype(jnp.float32))
    o_ref[...] = out.astype(o_ref.dtype)


def _bilinear_coords(out_size, in_size):
    # matches F.interpolate(mode='bilinear', align_corners=False)
    scale = in_size / out_size
    o = jnp.arange(out_size, dtype=jnp.float32)
    src = jnp.maximum((o + 0.5) * scale - 0.5, 0.0)
    i0 = jnp.clip(jnp.floor(src).astype(jnp.int32), 0, in_size - 1)
    i1 = jnp.clip(i0 + 1, 0, in_size - 1)
    lam = src - i0.astype(jnp.float32)
    return i0, i1, lam


def bilinear_resize(x, out_h, out_w):
    """Bilinear upsampling of NHWC bf16 features: corner gathers are cheap XLA
    slices of bf16 data; the 4-corner lerp is one Pallas VPU kernel with a
    compact (M, 4) per-row weight array."""
    # TODO(synk): a separable (horizontal then vertical) 2-tap lerp would halve the
    #             corner traffic further; not worth it at these tiny feature sizes.
    N, H, W, C = x.shape
    if out_h == H and out_w == W:
        return x
    i0h, i1h, lh = _bilinear_coords(out_h, H)
    i0w, i1w, lw = _bilinear_coords(out_w, W)
    xh0 = jnp.take(x, i0h, axis=1)
    xh1 = jnp.take(x, i1h, axis=1)
    x00, x01 = jnp.take(xh0, i0w, axis=2), jnp.take(xh0, i1w, axis=2)
    x10, x11 = jnp.take(xh1, i0w, axis=2), jnp.take(xh1, i1w, axis=2)

    w00 = (1.0 - lh)[:, None] * (1.0 - lw)[None, :]
    w01 = (1.0 - lh)[:, None] * lw[None, :]
    w10 = lh[:, None] * (1.0 - lw)[None, :]
    w11 = lh[:, None] * lw[None, :]
    wts = jnp.stack([w00, w01, w10, w11], axis=-1).reshape(out_h * out_w, 4)
    wts = jnp.tile(wts, (N, 1)).astype(jnp.float32)            # (M, 4)

    M = N * out_h * out_w
    Mp = _round_up(M, 16)

    def prep(t):
        t = t.reshape(M, C)
        return t if Mp == M else jnp.pad(t, ((0, Mp - M), (0, 0)))
    if Mp != M:
        wts = jnp.pad(wts, ((0, Mp - M), (0, 0)))

    TM = _row_tile(Mp)
    out = pl.pallas_call(
        _lerp4_kernel,
        out_shape=jax.ShapeDtypeStruct((Mp, C), x.dtype),
        grid_spec=pltpu.PrefetchScalarGridSpec(
            num_scalar_prefetch=0,
            grid=(Mp // TM,),
            in_specs=[pl.BlockSpec((TM, C), lambda i: (i, 0)) for _ in range(4)]
                     + [pl.BlockSpec((TM, 4), lambda i: (i, 0))],
            out_specs=pl.BlockSpec((TM, C), lambda i: (i, 0))),
        compiler_params=pltpu.CompilerParams(dimension_semantics=("parallel",),
                                             vmem_limit_bytes=_VMEM_LIMIT),
    )(prep(x00), prep(x01), prep(x10), prep(x11), wts)
    return (out if Mp == M else out[:M]).reshape(N, out_h, out_w, C)


# ------------------------------------------------------------------
# Conv / BN glue around the Pallas matmul
# ------------------------------------------------------------------

def _im2col(x, k, stride, pad, k_target):
    """Extract kxk patches of bf16, channel-padded NHWC input and (optionally)
    append zero columns so the patch width matches the pre-padded weight K."""
    # TODO(synk): replace with implicit GEMM (tap grid axis + shifted-window reads).
    N, H, W, C = x.shape
    xp = jnp.pad(x, ((0, 0), (pad, pad), (pad, pad), (0, 0)))
    OH = (H + 2 * pad - k) // stride + 1
    OW = (W + 2 * pad - k) // stride + 1
    cols = []
    for dy in range(k):
        for dx in range(k):
            cols.append(xp[:, dy:dy + stride * (OH - 1) + 1:stride,
                           dx:dx + stride * (OW - 1) + 1:stride, :])
    kk = k * k * C
    if k_target > kk:
        cols.append(jnp.zeros((N, OH, OW, k_target - kk), x.dtype))
    A = jnp.concatenate(cols, axis=-1).reshape(N * OH * OW, k_target)
    return A, OH, OW


def conv_bn(x, p, *, k, stride, pad, relu, residual=None):
    """Conv2d(bias=False) + BatchNorm(eval, scale folded into weights)
    [+ residual] [+ ReLU], all inside one fused Pallas matmul.  `k`, `stride`,
    `pad` are Python ints supplied at the (static) call sites."""
    N = x.shape[0]
    Kw = p['w'].shape[0]
    if k == 1:
        xs = x[:, ::stride, ::stride, :] if stride > 1 else x
        OH, OW = xs.shape[1], xs.shape[2]
        A = xs.reshape(N * OH * OW, xs.shape[3])
        assert A.shape[1] == Kw, (A.shape, Kw)
    else:
        A, OH, OW = _im2col(x, k, stride, pad, Kw)
    res = None
    if residual is not None:
        res = residual.reshape(N * OH * OW, residual.shape[3])
    out = fused_matmul(A, p['w'], p['b'], residual=res, relu=relu)
    return out.reshape(N, OH, OW, out.shape[1])


# ------------------------------------------------------------------
# ResNet (scaled-down resnet50-style backbone)
# ------------------------------------------------------------------
# TODO(synk): torchvision resnet50 uses stem width 64, bottleneck widths
# (64,128,256,512), block counts (3,4,6,3) and IMAGENET1K_V2 pretrained weights;
# here widths/depth are scaled down and weights are deterministic synthetic, while
# keeping the exact per-layer stride / bottleneck / interpolate / concat semantics
# of the reference forward pass.
STEM_WIDTH = 16
LAYER_WIDTHS = (16, 32, 64, 128)
LAYER_BLOCKS = (1, 1, 1, 1)
LAYER_STRIDES = (1, 2, 2, 2)
EXPANSION = 4
_OUT_STRIDES = (4, 8, 16, 32)


def _init_conv_bn(key, cin, cout, k, cin_carried):
    """Conv(kxk, no bias) + eval BatchNorm folded into a single padded matmul
    weight (Kp, Np) bf16 and bias (1, Np) f32, laid out for the channel-padded
    im2col column order used by conv_bn.  Only arrays are returned (jit-safe)."""
    kw_, kg, kb, km, kv = jax.random.split(key, 5)
    fan_in = cin * k * k
    w = jax.random.normal(kw_, (cout, cin, k, k), jnp.float32) * (2.0 / fan_in) ** 0.5
    gamma = 1.0 + 0.1 * jax.random.normal(kg, (cout,), jnp.float32)
    beta = 0.1 * jax.random.normal(kb, (cout,), jnp.float32)
    mean = 0.1 * jax.random.normal(km, (cout,), jnp.float32)
    var = 1.0 + 0.1 * jnp.abs(jax.random.normal(kv, (cout,), jnp.float32))
    scale = gamma / jnp.sqrt(var + 1e-5)

    n_pad = _round_up(cout, 128)
    # fold BN scale into weight, go to (k, k, cin, cout), pad cin -> carried width
    # and cout -> 128-multiple, then flatten to matmul layout.
    wt = jnp.transpose(w * scale[:, None, None, None], (2, 3, 1, 0))
    wt = jnp.pad(wt, ((0, 0), (0, 0), (0, cin_carried - cin), (0, n_pad - cout)))
    wmat = wt.reshape(k * k * cin_carried, n_pad)
    if k > 1:  # round K to a 256 multiple so TK=256 tiles match the 256x256 MXU
        k_pad = _round_up(k * k * cin_carried, 256)
        wmat = jnp.pad(wmat, ((0, k_pad - wmat.shape[0]), (0, 0)))
    bias = jnp.pad((beta - mean * scale).reshape(1, cout), ((0, 0), (0, n_pad - cout)))
    return {'w': wmat.astype(jnp.bfloat16), 'b': bias.astype(jnp.float32)}


def _init_bottleneck(key, cin, width, stride):
    k1, k2, k3, k4 = jax.random.split(key, 4)
    cin_pad = _round_up(cin, 128)
    width_pad = _round_up(width, 128)
    p = {'conv1': _init_conv_bn(k1, cin, width, 1, cin_pad),
         'conv2': _init_conv_bn(k2, width, width, 3, width_pad),
         'conv3': _init_conv_bn(k3, width, width * EXPANSION, 1, width_pad)}
    if stride != 1 or cin != width * EXPANSION:
        p['downsample'] = _init_conv_bn(k4, cin, width * EXPANSION, 1, cin_pad)
    return p


def init_resnet_params(key):
    keys = jax.random.split(key, 5)
    params = {'stem': _init_conv_bn(keys[0], 3, STEM_WIDTH, 7, cin_carried=3)}
    cin = STEM_WIDTH
    for li, (w, nblk, st) in enumerate(zip(LAYER_WIDTHS, LAYER_BLOCKS, LAYER_STRIDES)):
        blocks = []
        bkeys = jax.random.split(keys[li + 1], nblk)
        for bi in range(nblk):
            blocks.append(_init_bottleneck(bkeys[bi], cin, w, st if bi == 0 else 1))
            cin = w * EXPANSION
        params[f'layer{li + 1}'] = blocks
    return params


def _bottleneck_forward(x, p, stride):
    out = conv_bn(x, p['conv1'], k=1, stride=1, pad=0, relu=True)
    out = conv_bn(out, p['conv2'], k=3, stride=stride, pad=1, relu=True)
    if 'downsample' in p:
        identity = conv_bn(x, p['downsample'], k=1, stride=stride, pad=0, relu=False)
    else:
        identity = x
    # conv3 + BN + residual add + ReLU fused in a single Pallas call
    return conv_bn(out, p['conv3'], k=1, stride=1, pad=0, relu=True, residual=identity)


@functools.partial(jax.jit, static_argnums=(2, 3))
def resnet_forward(params, x_nchw, out_stride, out_layers):
    """Mirrors ResNet.forward of DSALVANet: layer0..layer4, per-layer bilinear
    resize to `out_stride`, channel concat.  Input/Output are NCHW float32."""
    x = jnp.transpose(x_nchw, (0, 2, 3, 1)).astype(jnp.bfloat16)   # -> NHWC bf16
    # layer0: conv7x7/s2 + BN + ReLU + maxpool3x3/s2
    x = conv_bn(x, params['stem'], k=7, stride=2, pad=3, relu=True)
    x = maxpool_3x3_s2_p1(x)
    feats = []
    for li in range(4):
        for bi, blk in enumerate(params[f'layer{li + 1}']):
            x = _bottleneck_forward(x, blk, LAYER_STRIDES[li] if bi == 0 else 1)
        feats.append(x)
    feat_list = []
    for i in out_layers:
        scale_factor = _OUT_STRIDES[i - 1] / out_stride
        f = feats[i - 1]
        oh = int(f.shape[1] * scale_factor)
        ow = int(f.shape[2] * scale_factor)
        f = bilinear_resize(f, oh, ow)
        feat_list.append(f[..., :LAYER_WIDTHS[i - 1] * EXPANSION])  # strip pad channels
    feat = jnp.concatenate(feat_list, axis=-1).astype(jnp.float32)  # channel concat
    return jnp.transpose(feat, (0, 3, 1, 2))                        # back to NCHW


if __name__ == "__main__":
    key = jax.random.PRNGKey(0)
    pkey, xkey = jax.random.split(key)
    params = init_resnet_params(pkey)

    # --- small numerics sanity check of the fused matmul against an f32 reference ---
    ka, kb = jax.random.split(xkey)
    A = jax.random.normal(ka, (64, 256), jnp.float32).astype(jnp.bfloat16)
    B = jax.random.normal(kb, (256, 128), jnp.float32).astype(jnp.bfloat16)
    bias = jnp.linspace(-1.0, 1.0, 128, dtype=jnp.float32).reshape(1, 128)
    got = fused_matmul(A, B, bias, relu=True).astype(jnp.float32)
    ref = jnp.maximum(A.astype(jnp.float32) @ B.astype(jnp.float32) + bias, 0.0)
    assert jnp.allclose(got, ref, rtol=2e-2, atol=2e-2), float(jnp.max(jnp.abs(got - ref)))

    # --- full forward pass ---
    out_stride = 8
    out_layers = (3, 4)
    x = jax.random.normal(xkey, (2, 3, 64, 64), jnp.float32)   # NCHW like PyTorch

    out = resnet_forward(params, x, out_stride, out_layers)
    out = jax.block_until_ready(out)

    expected_c = sum(LAYER_WIDTHS[i - 1] * EXPANSION for i in out_layers)
    assert out.shape == (2, expected_c, 64 // out_stride, 64 // out_stride), out.shape
    assert bool(jnp.all(jnp.isfinite(out)))
    print("KERNEL_OK")
</pallas_src>

<mosaic_0001>
module attributes {stable_mosaic.version = 11 : i64} {
  func.func @_mm_kernel(%arg0: i32, %arg1: i32, %arg2: i32, %arg3: memref<32x256xbf16, #tpu.memory_space<vmem>>, %arg4: memref<256x128xbf16, #tpu.memory_space<vmem>>, %arg5: memref<1x128xf32, #tpu.memory_space<vmem>>, %arg6: memref<32x128xbf16, #tpu.memory_space<vmem>>, %arg7: memref<32x128xf32, #tpu.memory_space<vmem>>) attributes {dimension_semantics = [#tpu.dimension_semantics<parallel>, #tpu.dimension_semantics<parallel>, #tpu.dimension_semantics<arbitrary>], iteration_bounds = array<i64: 2, 1, 1>, scalar_prefetch = 0 : i64, scratch_operands = 1 : i64, tpu.core_type = #tpu.core_type<tc>, window_params = [{transform_indices = @transform_0, window_bounds = array<i64: 32, 256>}, {transform_indices = @transform_1, window_bounds = array<i64: 256, 128>}, {transform_indices = @transform_2, window_bounds = array<i64: 1, 128>}, {transform_indices = @transform_3, window_bounds = array<i64: 32, 128>}]} {
    %c0_i32 = arith.constant 0 : i32
    %0 = arith.cmpi eq, %arg2, %c0_i32 : i32
    %1 = arith.extui %0 : i1 to i32
    %c0_i32_0 = arith.constant 0 : i32
    %2 = arith.cmpi ne, %1, %c0_i32_0 : i32
    scf.if %2 {
      %cst_10 = arith.constant 0.000000e+00 : f32
      %12 = vector.broadcast %cst_10 : f32 to vector<32x128xf32>
      %c0_11 = arith.constant 0 : index
      %c0_12 = arith.constant 0 : index
      %13 = vector.load %arg7[%c0_11, %c0_12] : memref<32x128xf32, #tpu.memory_space<vmem>>, vector<32x128xf32>
      tpu.vector_store %arg7[%c0_11, %c0_12], %12 {strides = array<i32>} : memref<32x128xf32, #tpu.memory_space<vmem>>, vector<32x128xf32>,
    } else {
    }
    %c0 = arith.constant 0 : index
    %c0_1 = arith.constant 0 : index
    %3 = vector.load %arg7[%c0, %c0_1] : memref<32x128xf32, #tpu.memory_space<vmem>>, vector<32x128xf32>
    %c0_2 = arith.constant 0 : index
    %c0_3 = arith.constant 0 : index
    %4 = vector.load %arg3[%c0_2, %c0_3] : memref<32x256xbf16, #tpu.memory_space<vmem>>, vector<32x256xbf16>
    %c0_4 = arith.constant 0 : index
    %c0_5 = arith.constant 0 : index
    %5 = vector.load %arg4[%c0_4, %c0_5] : memref<256x128xbf16, #tpu.memory_space<vmem>>, vector<256x128xbf16>
    %cst = arith.constant dense<0.000000e+00> : vector<32x128xf32>
    %6 = tpu.matmul %4, %5, %cst {dimension_numbers = #tpu.dot_dimension_numbers<[1], [0], [0], [1], [0, 0, 1, 1], [], []>} : vector<32x256xbf16>, vector<256x128xbf16>, vector<32x128xf32> -> vector<32x128xf32>
    %7 = arith.addf %3, %6 : vector<32x128xf32>
    %c0_6 = arith.constant 0 : index
    %c0_7 = arith.constant 0 : index
    %8 = vector.load %arg7[%c0_6, %c0_7] : memref<32x128xf32, #tpu.memory_space<vmem>>, vector<32x128xf32>
    tpu.vector_store %arg7[%c0_6, %c0_7], %7 {strides = array<i32>} : memref<32x128xf32, #tpu.memory_space<vmem>>, vector<32x128xf32>,
    %c0_i32_8 = arith.constant 0 : i32
    %9 = arith.cmpi eq, %arg2, %c0_i32_8 : i32
    %10 = arith.extui %9 : i1 to i32
    %c0_i32_9 = arith.constant 0 : i32
    %11 = arith.cmpi ne, %10, %c0_i32_9 : i32
    scf.if %11 {
      %c0_10 = arith.constant 0 : index
      %c0_11 = arith.constant 0 : index
      %12 = vector.load %arg7[%c0_10, %c0_11] : memref<32x128xf32, #tpu.memory_space<vmem>>, vector<32x128xf32>
      %c0_12 = arith.constant 0 : index
      %c0_13 = arith.constant 0 : index
      %13 = vector.load %arg5[%c0_12, %c0_13] : memref<1x128xf32, #tpu.memory_space<vmem>>, vector<1x128xf32>
      %14 = vector.broadcast %13 : vector<1x128xf32> to vector<32x128xf32>
      %15 = arith.addf %12, %14 : vector<32x128xf32>
      %cst_14 = arith.constant 0.000000e+00 : f32
      %16 = vector.broadcast %cst_14 : f32 to vector<32x128xf32>
      %17 = arith.maximumf %15, %16 : vector<32x128xf32>
      %18 = arith.truncf %17 : vector<32x128xf32> to vector<32x128xbf16>
      %c0_15 = arith.constant 0 : index
      %c0_16 = arith.constant 0 : index
      %19 = vector.load %arg6[%c0_15, %c0_16] : memref<32x128xbf16, #tpu.memory_space<vmem>>, vector<32x128xbf16>
      tpu.vector_store %arg6[%c0_15, %c0_16], %18 {strides = array<i32>} : memref<32x128xbf16, #tpu.memory_space<vmem>>, vector<32x128xbf16>,
    } else {
    }
    return
  }
  func.func @transform_0(%arg0: i32, %arg1: i32, %arg2: i32) -> (i32, i32) {
    %c0_i32 = arith.constant 0 : i32
    return %arg0, %arg2 : i32, i32
  }
  func.func @transform_1(%arg0: i32, %arg1: i32, %arg2: i32) -> (i32, i32) {
    %c0_i32 = arith.constant 0 : i32
    return %arg2, %arg1 : i32, i32
  }
  func.func @transform_2(%arg0: i32, %arg1: i32, %arg2: i32) -> (i32, i32) {
    %c0_i32 = arith.constant 0 : i32
    %c0_i32_0 = arith.constant 0 : i32
    return %c0_i32, %arg1 : i32, i32
  }
  func.func @transform_3(%arg0: i32, %arg1: i32, %arg2: i32) -> (i32, i32) {
    %c0_i32 = arith.constant 0 : i32
    return %arg0, %arg1 : i32, i32
  }
}

</mosaic_0001>

<bundles_post_ra>
// kernel: tpu_custom_call.1
= control target key start
LH: loop header
LB: loop body
LE: loop exit
PB: predicated region body
PF: predicated region fallthrough
CT: control target
= control target key end

     0   :  { %s1199_s0 = inlined_call_operand.hbm [shape: bf16[64,256], index: 0, kind: input, shape index: {}]   ;;  %s1200_s1 = inlined_call_operand.hbm [shape: bf16[256,128], index: 1, kind: input, shape index: {}]   ;;  %s1201_s2 = inlined_call_operand.vmem [shape: f32[1,128], index: 2, kind: input, shape index: {}]   ;;  %s1202_s3 = inlined_call_operand.hbm [shape: bf16[64,128], index: 3, kind: output, shape index: {}]  }
   0x1   :  { %1203 = sst [smem:[#allocation12_spill]] %s1200_s1 }
   0x2   :  { %8 = vsyncpa [#allocation4], 0 }
   0x3   :  { %10 = vsyncpa [#allocation4 + $0x1], 0 }
   0x4   :  { %11 = vsyncpa [#allocation7], 0 }
   0x5   :  { %12 = vsyncpa [#allocation5], 0 }
   0x6   :  { %14 = vsyncpa [#allocation5 + $0x1], 0  ;;  %s1036_s12 = smov 0   ;;  %s1038_s13 = smov 0  }
   0x7   :  { %s1040_s14 = smov 0   ;;  %s1042_s15 = smov 0  }
   0x8   :  { %s1044_s16 = smov 0   ;;  %s1046_s17 = smov 0  }
   0x9 LB: > { %s632_s18 = sadd.s32 4294967295, %s1007_s17   ;;  %s633_s19 = sadd.s32 4294967294, %s1007_s17   ;;  %s1007_s17 = sphi %s1046_s17, %s20_s17   ;;  %s1003_s16 = sphi %s1044_s16, %s1216_s16   ;;  %s999_s15 = sphi %s1042_s15, %s1215_s15   ;;  %s995_s14 = sphi %s1040_s14, %s1214_s14   ;;  %s991_s13 = sphi %s1038_s13, %s1213_s13   ;;  %s987_s12 = sphi %s1036_s12, %s1212_s12  }
   0xa   : > { %p61_p0 = scmp.ne.s32.totalorder %s991_s13, %s987_s12  ;;  %p1070_p1 = scmp.eq.s32.totalorder %s632_s18, 0 }
   0xb   : > { %p1074_p2 = scmp.eq.s32.totalorder %s632_s18, 1  ;;  %p147_p3 = scmp.eq.s32.totalorder %s633_s19, 1 }
   0xc   : > { %p1080_p4 = por %p1070_p1, %p61_p0  ;;  %p634_p5 = scmp.ge.s32.totalorder %s1007_s17, 1 }
   0xd   : > { %p1085_p6 = por %p147_p3, %p61_p0  ;;  %p154_p7 = scmp.lt.s32.totalorder %s1007_s17, 3 }
   0xe   : > { %s1208_s1 = sld [smem:[#allocation12_spill]]  ;;  %s1009_s28 = smov [#allocation6]  }
   0xf   : > { %p1093_p8 = pnand %p634_p5, %p154_p7  ;;  %s171_s29 = sshll.u32 %s1009_s28, 4  ;;  %s172_s29 = int_to_ptr.vmem [resolvable:$true] %s171_s29 }
  0x10   : > { %p637_p11 = scmp.ge.s32.totalorder %s1007_s17, 2  ;;  %s1010_s30 = smov 64  }
  0x11   : > { %p789_p9 = pneg %p1093_p8  ;;  %s1011_s4 = smov 4  }
  0x12   : > { %s39_s5 = sadd.s32 1, %s1003_s16  ;;  %s48_s6 = sadd.s32 1, %s995_s14 }
  0x13   : > { %p790_p10 = pnand %p789_p9, %p1070_p1  ;;  %p41_p12 = scmp.ge.s32.totalorder %s39_s5, 2 }
  0x14   : > { %s169_s26 = sshll.u32 %s1208_s1, 4  ;;  %p55_p13 = scmp.ne.s32.totalorder %s995_s14, %s991_s13  ;;  %s170_s26 = int_to_ptr.hbm [resolvable:$true] %s169_s26 }
  0x15   : > { %792 = dma.hbm_to_vmem [thread:$0]  (!%p790_p10), %s170_s26, 2048, %s172_s29, [#allocation7], %s1010_s30, %s1010_s30, %s1011_s4  }
  0x16   : > { %p56_p0 = scmp.eq.s32.totalorder %s1007_s17, 0  ;;  %s1218_s5 = smov (%p41_p12, %s39_s5), 0 }
  0x17   : > { %p1115_p5 = por %p1074_p2, %p55_p13  ;;  %s43_s9 = ssub.s32 %s1003_s16, %s1218_s5 }
  0x18   : > { %p1109_p3 = por %p56_p0, %p55_p13  ;;  %p802_p7 = scmp.lt.s32.totalorder %s1007_s17, 2 }
  0x19   : > { %p46_p9 = scmp.eq.s32.totalorder %s43_s9, 0  ;;  %s191_s10 = sand.u32 1, %s995_s14  }
  0x1a   : > { %s638_s11 = sshll.u32 %s191_s10, 5  ;;  %s732_s19 = sshll.u32 %s1003_s16, 5 }
  0x1b   : > { %s1124_s18 = scalar_select %p46_p9, %s995_s14, %s48_s6  }
  0x1c   : > { %s203_s26 = scalar_lea.hbm %s1199_s0, %s732_s19  ;;  %s195_s28 = scalar_lea.vmem [#allocation3], %s638_s11 }
  0x1d   : > { %s206_s29 = sshll.u32 %s195_s28, 4  ;;  %s204_s21 = sshll.u32 %s203_s26, 4  ;;  %s207_s29 = int_to_ptr.vmem [resolvable:$true] %s206_s29  ;;  %s205_s21 = int_to_ptr.hbm [resolvable:$true] %s204_s21 }
  0x1e   : > { %p794_p2 = pnand %p802_p7, %p1109_p3  ;;  %s192_s30 = scalar_lea.sflag [#allocation4], %s191_s10 }
  0x1f   : > { %s1012_s4 = smov 128   ;;  %s1013_s1 = smov 8  }
  0x20   : > { %796 = dma.hbm_to_vmem [thread:$0]  (!%p794_p2), %s205_s21, 512, %s207_s29, %s192_s30, %s1012_s4, %s1012_s4, %s1013_s1  }
  0x21   : > { %218 = sbr.rel (%p1093_p8) target bundleno = 226 (0xe2), region = 32  ;;  %s1135_s6 = sand.u32 (!%p1093_p8), 1, %s991_s13  }
  0x22   : > { %s643_s9 = sshll.u32 (!%p1093_p8), %s1135_s6, 5  ;;  %s221_s11 = scalar_lea.sflag (!%p1093_p8), [#allocation4], %s1135_s6 }
  0x23   : > { %s1139_s19 = scalar_lea.vmem (!%p1093_p8), [#allocation3], %s643_s9 }
  0x26   : > { %974 = dma.done.wait (%p1080_p4), %s221_s11, 512  }
  0x27   : > { %976 = vsyncadd (%p1080_p4), %s221_s11, 4294966784 }
  0x28   : > { %978 = dma.done.wait (%p1070_p1), [#allocation7], 2048  }
  0x29   : > { %980 = vsyncadd (%p1070_p1), [#allocation7], 4294965248  ;;  %v744_v0 = vld [vmem:[#allocation6 + $0x38] sm:$0xff]  ;;  %v743_v2 = vld [vmem:[#allocation6 + $0x30] sm:$0xff]  ;;  %s645_s22 = sshll.u32 %s1135_s6, 4  ;;  %s753_s27 = sshll.u32 %s999_s15, 4 }
  0x2a   : > { %v752_v1 = vld [vmem:[#allocation6 + $0x78] sm:$0xff]  ;;  %427 = vmatpush.bf16.msra.mxu0 %v744_v0  ;;  %765 = vmatpush.bf16.msra.mxu2 %v744_v0  ;;  %v751_v3 = vld [vmem:[#allocation6 + $0x70] sm:$0xff]  ;;  %v742_v4 = vld [vmem:[#allocation6 + $0x28] sm:$0xff]  ;;  %s513_s24 = scalar_lea.hbm %s1202_s3, %s753_s27  ;;  %s255_s25 = scalar_lea.vmem [#allocation8], %s645_s22 }
  0x2b   : > { %446 = vmatpush.bf16.msra.mxu1 %v752_v1  ;;  %773 = vmatpush.bf16.msra.mxu3 %v752_v1  ;;  %v750_v5 = vld [vmem:[#allocation6 + $0x68] sm:$0xff]  ;;  %v741_v6 = vld [vmem:[#allocation6 + $0x20] sm:$0xff]  ;;  %v740_v8 = vld [vmem:[#allocation6 + $0x18] sm:$0xff]  ;;  %s514_s26 = sshll.u32 %s255_s25, 4  ;;  %s516_s28 = sshll.u32 %s513_s24, 4  ;;  %s515_s26 = int_to_ptr.vmem [resolvable:$true] %s514_s26  ;;  %s517_s28 = int_to_ptr.hbm [resolvable:$true] %s516_s28 }
  0x2c   : > { %v749_v7 = vld [vmem:[#allocation6 + $0x60] sm:$0xff]  ;;  %v748_v9 = vld [vmem:[#allocation6 + $0x58] sm:$0xff]  ;;  %v739_v10 = vld [vmem:[#allocation6 + $0x10] sm:$0xff]  ;;  %s501_s15 = scalar_lea.sflag [#allocation5], %s1135_s6  ;;  %s935_s29 = sshra.s32 %s517_s28, 4  ;;  %s936_s29 = int_to_ptr.hbm [resolvable:$true] %s935_s29 }
  0x2d   : > { %v747_v11 = vld [vmem:[#allocation6 + $0x50] sm:$0xff]  ;;  %v738_v12 = vld [vmem:[#allocation6 + $0x8] sm:$0xff]  ;;  %v737_v14 = vld [vmem:[#allocation6] sm:$0xff]  ;;  %s937_s21 = scalar_lea.hbm %s936_s29, 16  ;;  %s941_s9 = scalar_lea.hbm %s1202_s3, 32 }
  0x2e   : > { %428 = vmatpush.bf16.msra.mxu0 %v743_v2  ;;  %766 = vmatpush.bf16.msra.mxu2 %v743_v2  ;;  %v746_v13 = vld [vmem:[#allocation6 + $0x48] sm:$0xff]  ;;  %v745_v15 = vld [vmem:[#allocation6 + $0x40] sm:$0xff]  ;;  %v656_v18 = vld [vmem:[%s1139_s19 + $0x10] sm:$0xf]  ;;  %p938_p1 = scmp.ne.s32.totalorder %s936_s29, %s937_s21  ;;  %p942_p10 = scmp.lt.s32.totalorder %s936_s29, %s1202_s3 }
  0x2f   : > { %447 = vmatpush.bf16.msra.mxu1 %v751_v3  ;;  %774 = vmatpush.bf16.msra.mxu3 %v751_v3  ;;  %v648_v16 = vld [vmem:[%s1139_s19] sm:$0xf]  ;;  %v734_v17 = vld [vmem:[%s1139_s19 + $0x4] sm:$0xf0]  ;;  %v736_v19 = vld [vmem:[%s1139_s19 + $0x14] sm:$0xf0]  ;;  %p943_p12 = scmp.lt.s32.totalorder %s941_s9, %s937_s21 }
  0x30   : > { %v733_v20 = vld [vmem:[%s1139_s19 + $0x4] sm:$0xf]  ;;  %v650_v21 = vld [vmem:[%s1139_s19 + $0x8] sm:$0xf0]  ;;  %v735_v22 = vld [vmem:[%s1139_s19 + $0x14] sm:$0xf]  ;;  %v649_v24 = vor.u32 %v734_v17, %v648_v16  ;;  %v657_v25 = vor.u32 %v736_v19, %v656_v18  ;;  %p939_p4 = pnand %p938_p1, %p1115_p5 }
  0x31   : > { %v658_v23 = vld [vmem:[%s1139_s19 + $0x18] sm:$0xf0]  ;;  %v653_v26 = vor.u32 %v733_v20, %v650_v21  ;;  %v860_v31 = vld [vmem:[%s1201_s2] ss:$0 sm:$0xff]  ;;  %p944_p13 = por %p943_p12, %p942_p10 }
  0x32   : > { %429 = vmatpush.bf16.msra.mxu0 %v742_v4  ;;  %767 = vmatpush.bf16.msra.mxu2 %v742_v4  ;;  %v661_v27 = vor.u32 %v735_v22, %v658_v23  ;;  %p940_p8 = pneg %p939_p4 }
  0x33   : > { %448 = vmatpush.bf16.msra.mxu1 %v750_v5  ;;  %775 = vmatpush.bf16.msra.mxu3 %v750_v5 }
  0x34   : > { %p945_p0 = pnand %p944_p13, %p940_p8 }
  0x36   : > { %430 = vmatpush.bf16.msra.mxu0 %v741_v6  ;;  %768 = vmatpush.bf16.msra.mxu2 %v741_v6 }
  0x37   : > { %449 = vmatpush.bf16.msra.mxu1 %v749_v7  ;;  %776 = vmatpush.bf16.msra.mxu3 %v749_v7 }
  0x3a   : > { %431 = vmatpush.bf16.msra.mxu0 %v740_v8  ;;  %769 = vmatpush.bf16.msra.mxu2 %v740_v8 }
  0x3b   : > { %450 = vmatpush.bf16.msra.mxu1 %v748_v9  ;;  %777 = vmatpush.bf16.msra.mxu3 %v748_v9 }
  0x3e   : > { %432 = vmatpush.bf16.msra.mxu0 %v739_v10  ;;  %770 = vmatpush.bf16.msra.mxu2 %v739_v10 }
  0x3f   : > { %451 = vmatpush.bf16.msra.mxu1 %v747_v11  ;;  %778 = vmatpush.bf16.msra.mxu3 %v747_v11 }
  0x42   : > { %433 = vmatpush.bf16.msra.mxu0 %v738_v12  ;;  %771 = vmatpush.bf16.msra.mxu2 %v738_v12 }
  0x43   : > { %452 = vmatpush.bf16.msra.mxu1 %v746_v13  ;;  %779 = vmatpush.bf16.msra.mxu3 %v746_v13 }
  0x46   : > { %434 = vmatpush.bf16.msra.mxu0 %v737_v14  ;;  %772 = vmatpush.bf16.msra.mxu2 %v737_v14 }
  0x47   : > { %453 = vmatpush.bf16.msra.mxu1 %v745_v15  ;;  %780 = vmatpush.bf16.msra.mxu3 %v745_v15 }
  0x49   : > { %435 = vmatmul.bf16.vlgmr.msra.gmra.mxu0 %v649_v24  ;;  %440 = vmatmul.bf16.vlgmr.msra.gmra.mxu2 %v657_v25 }
  0x4a   : > { %454 = vmatmul.bf16.vlgmr.msra.gmra.mxu1 %v653_v26  ;;  %459 = vmatmul.bf16.vlgmr.msra.gmra.mxu3 %v661_v27 }
  0xc6   : > { %v436_v28 = vpop.f32.mrf.mxu0 }
  0xc7   : > { %v455_v29 = vpop.f32.mrf.mxu1 }
  0xc8   : > { %v456_v30 = vadd.f32 %v455_v29, %v436_v28 }
  0xca   : > { %v484_v36 = vadd.f32 %v860_v31, %v456_v30 }
  0xcc   : > { %v441_v32 = vpop.f32.mrf.mxu2  ;;  %v488_v40 = vmax.f32 %v484_v36, 0.0 }
  0xcd   : > { %v460_v33 = vpop.f32.mrf.mxu3 }
  0xce   : > { %v438_v34 = vpop.f32.mrf.mxu0  ;;  %v461_v38 = vadd.f32 %v460_v33, %v441_v32 }
  0xcf   : > { %v457_v35 = vpop.f32.mrf.mxu1 }
  0xd0   : > { %v458_v37 = vadd.f32 %v457_v35, %v438_v34  ;;  %v486_v44 = vadd.f32 %v860_v31, %v461_v38 }
  0xd2   : > { %v485_v39 = vadd.f32 %v860_v31, %v458_v37  ;;  %v490_v48 = vmax.f32 %v486_v44, 0.0 }
  0xd4   : > { %v489_v41 = vmax.f32 %v485_v39, 0.0  ;;  %v443_v42 = vpop.f32.mrf.mxu2 }
  0xd5   : > { %v462_v43 = vpop.f32.mrf.mxu3 }
  0xd6   : > { %v757_v45 = vpack.c.bf16 %v489_v41, %v488_v40  ;;  %v463_v46 = vadd.f32 %v462_v43, %v443_v42 }
  0xd8   : > { %758 = vst [vmem:[%s255_s25] sm:$0xff] %v757_v45   ;;  %v487_v47 = vadd.f32 %v860_v31, %v463_v46 }
  0xda   : > { %v491_v49 = vmax.f32 %v487_v47, 0.0 }
  0xdc   : > { %v762_v50 = vpack.c.bf16 %v491_v49, %v490_v48 }
  0xde   : > { %764 = vst [vmem:[%s255_s25 + $0x8] sm:$0xff] %v762_v50  }
  0xdf   : > { %948 = shalt.err (!%p945_p0)
}
  0xe0   : > { %s1014_s6 = smov 64   ;;  %s1015_s1 = smov 4  }
  0xe1   : > { %787 = dma.vmem_to_hbm [thread:$0]  (%p1115_p5), %s515_s26, 256, %s517_s28, %s501_s15, %s1014_s6, %s1014_s6, %s1015_s1  }
  0xe2 PF: > { %s531_s20 = sand.u32 1, %s987_s12   ;;  %p798_p3 = pnand %p637_p11, %p1085_p6 }
  0xe3   : > { %s532_s22 = scalar_lea.sflag [#allocation5], %s531_s20 }
  0xe4   : > { %p799_p7 = pneg %p798_p3 }
  0xe6   : > { %982 = dma.done.wait (%p799_p7), %s532_s22, 256  }
  0xe7   : > { %984 = vsyncadd (%p799_p7), %s532_s22, 4294967040  ;;  %s20_s17 = sadd.s32 1, %s1007_s17   ;;  %s1212_s12 = smov %s991_s13 }
  0xe8   : > { %p17_p9 = scmp.ge.s32.totalorder %s20_s17, 4   ;;  %s1213_s13 = smov %s995_s14 }
  0xe9   : > { %s1214_s14 = smov %s1124_s18  ;;  %s1215_s15 = smov %s1003_s16 }
  0xea   : > { %s1216_s16 = smov %s1218_s5  ;;  %19 = sbr.rel (!%p17_p9) target bundleno = 9 (0x9), region = 93 }
  0xef   :  { %538 = vsyncpa [#allocation4], 1 }
  0xf0   :  { %540 = vsyncpa [#allocation4 + $0x1], 1 }
  0xf1   :  { %541 = vsyncpa [#allocation7], 1 }
  0xf2   :  { %542 = vsyncpa [#allocation5], 1 }
  0xf3   :  { %544 = vsyncpa [#allocation5 + $0x1], 1 }

</bundles_post_ra>
